<compile_context>
chip_gen: v6e
topology: v6e:2x2x1
jax: 0.10.0
libtpu: 0.0.40
codegen_flags: <defaults>
</compile_context>

<pallas_src>
import jax
import jax.numpy as jnp
from jax.experimental import pallas as pl
from jax.experimental.pallas import tpu as pltpu


def _round_up(x, m):
    return ((x + m - 1) // m) * m


def _termination_kernel(x_ref, w1_ref, b1_ref, w2_ref, b2_ref, w3_ref, b3_ref,
                        o_ref):
    # x_ref: (tb, D) in the caller dtype (f32 or bf16); W1/W2 bf16; f32 accumulation.
    x = x_ref[...].astype(w1_ref.dtype)

    # Layer 1: Linear(D -> Hp) + ReLU   (Hp = hidden width padded to 128 lanes)
    h = jnp.dot(x, w1_ref[...], preferred_element_type=jnp.float32) + b1_ref[...]
    h = jnp.maximum(h, 0.0)

    # Layer 2: Linear(Hp -> Hp) + ReLU
    h = jnp.dot(h.astype(w2_ref.dtype), w2_ref[...],
                preferred_element_type=jnp.float32) + b2_ref[...]
    h = jnp.maximum(h, 0.0)

    # Output head: Linear(Hp -> 1) + sigmoid, kept in f32. Plain (tb,Hp)@(Hp,1)
    # matmul -> no transposed-RHS lowering, output writeback is only 4 B/row.
    logit = jnp.dot(h, w3_ref[...], preferred_element_type=jnp.float32) + b3_ref[0, 0]
    o_ref[...] = jax.nn.sigmoid(logit).astype(o_ref.dtype)


def prepare_params(params, compute_dtype=jnp.bfloat16):
    """One-time padding / casting of the (in, out) weights. Call once at init
    (hoisted out of the per-call forward per perf review)."""
    w1, b1, w2, b2, w3, b3 = params
    D, H = w1.shape
    Hp = _round_up(H, 128)
    f32 = jnp.float32
    w1p = jnp.zeros((D, Hp), f32).at[:, :H].set(w1).astype(compute_dtype)
    b1p = jnp.zeros((1, Hp), f32).at[:, :H].set(jnp.reshape(b1, (1, H)))
    w2p = jnp.zeros((Hp, Hp), f32).at[:H, :H].set(w2).astype(compute_dtype)
    b2p = jnp.zeros((1, Hp), f32).at[:, :H].set(jnp.reshape(b2, (1, H)))
    w3p = jnp.zeros((Hp, 1), f32).at[:H, :].set(jnp.reshape(w3, (H, 1)))
    b3p = jnp.asarray(b3, f32).reshape(1, 1)
    return (w1p, b1p, w2p, b2p, w3p, b3p)


def _vmem_limit_bytes():
    # ~3/4 of physical VMEM, capped: 96 MiB on v5e/v6e (128 MiB phys),
    # 48 MiB on v7x (64 MiB phys). Falls back to the v7x-safe value.
    try:
        phys = int(pltpu.get_tpu_info().vmem_capacity_bytes)
    except Exception:
        phys = 64 << 20
    return min(phys * 3 // 4, 100 << 20)


def model_termination_forward(state, padded_params, obs_list=None, *, tb=8192):
    """Fused Pallas forward. `obs_list` is accepted (and ignored) to mirror the
    PyTorch signature. `padded_params` must come from `prepare_params`."""
    del obs_list
    w1p, b1p, w2p, b2p, w3p, b3p = padded_params
    B, D = state.shape
    Hp = w1p.shape[1]

    vmem_limit = _vmem_limit_bytes()

    # --- VMEM-aware tile sizing (lane padding + activations accounted) -------
    lane_D = _round_up(D, 128)                       # (tb, D) tile pads to 128 lanes
    in_row_bytes = 2 * lane_D * state.dtype.itemsize  # double-buffered state tile
    out_row_bytes = 2 * 128 * 4                       # double-buffered (tb,1) f32, lane-padded
    act_row_bytes = 10 * Hp                           # f32/bf16 activation intermediates
    bytes_per_row = in_row_bytes + out_row_bytes + act_row_bytes
    weight_bytes = (w1p.size * w1p.dtype.itemsize + w2p.size * w2p.dtype.itemsize
                    + (b1p.size + b2p.size + w3p.size) * 4)
    budget = max(1 << 20, int(vmem_limit * 0.6) - 2 * weight_bytes)
    max_rows = max(128, (budget // bytes_per_row) // 128 * 128)

    if B <= 128:
        # Single full-array block (block_shape == array dims is always legal).
        tb_eff = B
    else:
        tb_eff = min(_round_up(tb, 128), max_rows, _round_up(B, 128))
        # Keep >= 2 grid steps so both v7x TensorCores get work (also guarantees
        # tb_eff <= B, so only the last block is ragged). No-op cost on v5e/v6e.
        tb_eff = min(tb_eff, _round_up(pl.cdiv(B, 2), 128))

    n_tiles = pl.cdiv(B, tb_eff)   # ragged tail handled by Pallas boundary masking

    return pl.pallas_call(
        _termination_kernel,
        out_shape=jax.ShapeDtypeStruct((B, 1), jnp.float32),
        grid_spec=pltpu.PrefetchScalarGridSpec(
            num_scalar_prefetch=0,
            grid=(n_tiles,),
            in_specs=[
                pl.BlockSpec((tb_eff, D), lambda i: (i, 0)),          # state tile
                pl.BlockSpec((D, Hp), lambda i: (0, 0)),              # W1 (bf16)
                pl.BlockSpec((1, Hp), lambda i: (0, 0)),              # b1 (f32)
                pl.BlockSpec((Hp, Hp), lambda i: (0, 0)),             # W2 (bf16)
                pl.BlockSpec((1, Hp), lambda i: (0, 0)),              # b2 (f32)
                pl.BlockSpec((Hp, 1), lambda i: (0, 0)),              # w3 col (f32)
                pl.BlockSpec(memory_space=pltpu.MemorySpace.SMEM),    # b3 scalar
            ],
            out_specs=pl.BlockSpec((tb_eff, 1), lambda i: (i, 0)),
        ),
        compiler_params=pltpu.CompilerParams(
            dimension_semantics=("parallel",),
            vmem_limit_bytes=vmem_limit),
    )(state, w1p, b1p, w2p, b2p, w3p, b3p)


def init_params(key, state_size, dense_n=64, output_size=1):
    """Deterministic synthetic parameters; weights stored as (in, out)."""
    ks = jax.random.split(key, 6)

    def lin(kw, kb, fan_in, fan_out):
        bound = 1.0 / jnp.sqrt(fan_in)
        w = jax.random.uniform(kw, (fan_in, fan_out), jnp.float32, -bound, bound)
        b = jax.random.uniform(kb, (1, fan_out), jnp.float32, -bound, bound)
        return w, b

    w1, b1 = lin(ks[0], ks[1], state_size, dense_n)
    w2, b2 = lin(ks[2], ks[3], dense_n, dense_n)
    w3, b3 = lin(ks[4], ks[5], dense_n, output_size)
    return (w1, b1, w2, b2, w3, b3)


def _reference_forward(state, params):
    w1, b1, w2, b2, w3, b3 = params
    h = jnp.maximum(state @ w1 + b1, 0.0)
    h = jnp.maximum(h @ w2 + b2, 0.0)
    return jax.nn.sigmoid(h @ w3 + b3)


if __name__ == "__main__":
    key = jax.random.PRNGKey(0)
    k_state, k_params = jax.random.split(key)

    batch, state_size = 200, 32          # small shapes consistent with the module
    state = jax.random.normal(k_state, (batch, state_size), jnp.float32)
    params = init_params(k_params, state_size)

    # One-time weight padding / bf16 cast (hoisted out of the forward).
    padded = jax.block_until_ready(prepare_params(params))

    ref = _reference_forward(state, params)

    # Multi-tile path: tb clamps to 128 -> 2 grid steps with a ragged last tile
    # (exercises the megacore split and the boundary masking; no jnp.pad used).
    out = jax.block_until_ready(
        model_termination_forward(state, padded, obs_list=[], tb=128))
    assert out.shape == (batch, 1), out.shape
    # bf16 matmul operands vs f32 reference -> loose-but-tight-enough tolerance.
    assert jnp.allclose(out, ref, atol=2e-2, rtol=2e-2), \
        float(jnp.max(jnp.abs(out - ref)))

    # Default (large-tile, VMEM-budgeted) path.
    out2 = jax.block_until_ready(
        model_termination_forward(state, padded, obs_list=[]))
    assert out2.shape == (batch, 1)
    assert jnp.allclose(out2, ref, atol=2e-2, rtol=2e-2)

    # Tiny-batch path: block shape equals the full array dims (single tile).
    small = state[:7]
    out3 = jax.block_until_ready(
        model_termination_forward(small, padded, obs_list=[]))
    assert out3.shape == (7, 1)
    assert jnp.allclose(out3, ref[:7], atol=2e-2, rtol=2e-2)

    print("KERNEL_OK")
</pallas_src>

<mosaic_0001>
module attributes {stable_mosaic.version = 11 : i64} {
  func.func @_termination_kernel(%arg0: i32, %arg1: memref<128x32xf32, #tpu.memory_space<vmem>>, %arg2: memref<32x128xbf16, #tpu.memory_space<vmem>>, %arg3: memref<1x128xf32, #tpu.memory_space<vmem>>, %arg4: memref<128x128xbf16, #tpu.memory_space<vmem>>, %arg5: memref<1x128xf32, #tpu.memory_space<vmem>>, %arg6: memref<128x1xf32, #tpu.memory_space<vmem>>, %arg7: memref<1x1xf32, #tpu.memory_space<smem>>, %arg8: memref<128x1xf32, #tpu.memory_space<vmem>>) attributes {dimension_semantics = [#tpu.dimension_semantics<parallel>], iteration_bounds = array<i64: 2>, scalar_prefetch = 0 : i64, scratch_operands = 0 : i64, tpu.core_type = #tpu.core_type<tc>, window_params = [{transform_indices = @transform_0, window_bounds = array<i64: 128, 32>}, {pipeline_mode = #tpu.pipeline_mode<synchronous>, transform_indices = @transform_1, window_bounds = array<i64: 32, 128>}, {pipeline_mode = #tpu.pipeline_mode<synchronous>, transform_indices = @transform_2, window_bounds = array<i64: 1, 128>}, {pipeline_mode = #tpu.pipeline_mode<synchronous>, transform_indices = @transform_3, window_bounds = array<i64: 128, 128>}, {pipeline_mode = #tpu.pipeline_mode<synchronous>, transform_indices = @transform_4, window_bounds = array<i64: 1, 128>}, {pipeline_mode = #tpu.pipeline_mode<synchronous>, transform_indices = @transform_5, window_bounds = array<i64: 128, 1>}, {transform_indices = @transform_6, window_bounds = array<i64: 1, 1>}, {transform_indices = @transform_7, window_bounds = array<i64: 128, 1>}]} {
    %c0 = arith.constant 0 : index
    %c0_0 = arith.constant 0 : index
    %0 = vector.load %arg1[%c0, %c0_0] : memref<128x32xf32, #tpu.memory_space<vmem>>, vector<128x32xf32>
    %1 = arith.truncf %0 : vector<128x32xf32> to vector<128x32xbf16>
    %c0_1 = arith.constant 0 : index
    %c0_2 = arith.constant 0 : index
    %2 = vector.load %arg2[%c0_1, %c0_2] : memref<32x128xbf16, #tpu.memory_space<vmem>>, vector<32x128xbf16>
    %cst = arith.constant dense<0.000000e+00> : vector<128x128xf32>
    %3 = tpu.matmul %1, %2, %cst {dimension_numbers = #tpu.dot_dimension_numbers<[1], [0], [0], [1], [0, 0, 1, 1], [], []>} : vector<128x32xbf16>, vector<32x128xbf16>, vector<128x128xf32> -> vector<128x128xf32>
    %c0_3 = arith.constant 0 : index
    %c0_4 = arith.constant 0 : index
    %4 = vector.load %arg3[%c0_3, %c0_4] : memref<1x128xf32, #tpu.memory_space<vmem>>, vector<1x128xf32>
    %5 = vector.broadcast %4 : vector<1x128xf32> to vector<128x128xf32>
    %6 = arith.addf %3, %5 : vector<128x128xf32>
    %cst_5 = arith.constant 0.000000e+00 : f32
    %7 = vector.broadcast %cst_5 : f32 to vector<128x128xf32>
    %8 = arith.maximumf %6, %7 : vector<128x128xf32>
    %9 = arith.truncf %8 : vector<128x128xf32> to vector<128x128xbf16>
    %c0_6 = arith.constant 0 : index
    %c0_7 = arith.constant 0 : index
    %10 = vector.load %arg4[%c0_6, %c0_7] : memref<128x128xbf16, #tpu.memory_space<vmem>>, vector<128x128xbf16>
    %cst_8 = arith.constant dense<0.000000e+00> : vector<128x128xf32>
    %11 = tpu.matmul %9, %10, %cst_8 {dimension_numbers = #tpu.dot_dimension_numbers<[1], [0], [0], [1], [0, 0, 1, 1], [], []>} : vector<128x128xbf16>, vector<128x128xbf16>, vector<128x128xf32> -> vector<128x128xf32>
    %c0_9 = arith.constant 0 : index
    %c0_10 = arith.constant 0 : index
    %12 = vector.load %arg5[%c0_9, %c0_10] : memref<1x128xf32, #tpu.memory_space<vmem>>, vector<1x128xf32>
    %13 = vector.broadcast %12 : vector<1x128xf32> to vector<128x128xf32>
    %14 = arith.addf %11, %13 : vector<128x128xf32>
    %cst_11 = arith.constant 0.000000e+00 : f32
    %15 = vector.broadcast %cst_11 : f32 to vector<128x128xf32>
    %16 = arith.maximumf %14, %15 : vector<128x128xf32>
    %c0_12 = arith.constant 0 : index
    %c0_13 = arith.constant 0 : index
    %17 = vector.load %arg6[%c0_12, %c0_13] : memref<128x1xf32, #tpu.memory_space<vmem>>, vector<128x1xf32>
    %cst_14 = arith.constant dense<0.000000e+00> : vector<128x1xf32>
    %18 = tpu.matmul %16, %17, %cst_14 {dimension_numbers = #tpu.dot_dimension_numbers<[1], [0], [0], [1], [0, 0, 1, 1], [], []>} : vector<128x128xf32>, vector<128x1xf32>, vector<128x1xf32> -> vector<128x1xf32>
    %c0_15 = arith.constant 0 : index
    %c0_16 = arith.constant 0 : index
    %19 = memref.load %arg7[%c0_15, %c0_16] : memref<1x1xf32, #tpu.memory_space<smem>>
    %20 = vector.broadcast %19 : f32 to vector<128x1xf32>
    %21 = arith.addf %18, %20 : vector<128x1xf32>
    %22 = arith.negf %21 : vector<128x1xf32>
    %23 = math.exp %22 : vector<128x1xf32>
    %cst_17 = arith.constant 1.000000e+00 : f32
    %24 = vector.broadcast %cst_17 : f32 to vector<128x1xf32>
    %25 = arith.addf %24, %23 : vector<128x1xf32>
    %26 = arith.divf %24, %25 : vector<128x1xf32>
    %c0_18 = arith.constant 0 : index
    %c0_19 = arith.constant 0 : index
    %27 = vector.load %arg8[%c0_18, %c0_19] : memref<128x1xf32, #tpu.memory_space<vmem>>, vector<128x1xf32>
    tpu.vector_store %arg8[%c0_18, %c0_19], %26 {strides = array<i32>} : memref<128x1xf32, #tpu.memory_space<vmem>>, vector<128x1xf32>,
    return
  }
  func.func @transform_0(%arg0: i32) -> (i32, i32) {
    %c0_i32 = arith.constant 0 : i32
    %c0_i32_0 = arith.constant 0 : i32
    return %arg0, %c0_i32 : i32, i32
  }
  func.func @transform_1(%arg0: i32) -> (i32, i32) {
    %c0_i32 = arith.constant 0 : i32
    %c0_i32_0 = arith.constant 0 : i32
    %c0_i32_1 = arith.constant 0 : i32
    return %c0_i32, %c0_i32_0 : i32, i32
  }
  func.func @transform_2(%arg0: i32) -> (i32, i32) {
    %c0_i32 = arith.constant 0 : i32
    %c0_i32_0 = arith.constant 0 : i32
    %c0_i32_1 = arith.constant 0 : i32
    return %c0_i32, %c0_i32_0 : i32, i32
  }
  func.func @transform_3(%arg0: i32) -> (i32, i32) {
    %c0_i32 = arith.constant 0 : i32
    %c0_i32_0 = arith.constant 0 : i32
    %c0_i32_1 = arith.constant 0 : i32
    return %c0_i32, %c0_i32_0 : i32, i32
  }
  func.func @transform_4(%arg0: i32) -> (i32, i32) {
    %c0_i32 = arith.constant 0 : i32
    %c0_i32_0 = arith.constant 0 : i32
    %c0_i32_1 = arith.constant 0 : i32
    return %c0_i32, %c0_i32_0 : i32, i32
  }
  func.func @transform_5(%arg0: i32) -> (i32, i32) {
    %c0_i32 = arith.constant 0 : i32
    %c0_i32_0 = arith.constant 0 : i32
    %c0_i32_1 = arith.constant 0 : i32
    return %c0_i32, %c0_i32_0 : i32, i32
  }
  func.func @transform_6(%arg0: i32) -> (i32, i32) {
    %c0_i32 = arith.constant 0 : i32
    %c0_i32_0 = arith.constant 0 : i32
    %c0_i32_1 = arith.constant 0 : i32
    return %c0_i32, %c0_i32_0 : i32, i32
  }
  func.func @transform_7(%arg0: i32) -> (i32, i32) {
    %c0_i32 = arith.constant 0 : i32
    %c0_i32_0 = arith.constant 0 : i32
    return %arg0, %c0_i32 : i32, i32
  }
}

</mosaic_0001>

<bundles_post_ra>
// kernel: tpu_custom_call.1
= control target key start
LH: loop header
LB: loop body
LE: loop exit
PB: predicated region body
PF: predicated region fallthrough
CT: control target
= control target key end

     0   :  { %s2163_s0 = inlined_call_operand.vmem [shape: f32[200,32], index: 0, kind: input, shape index: {}]   ;;  %s2164_s1 = inlined_call_operand.vmem [shape: bf16[32,128], index: 1, kind: input, shape index: {}]   ;;  %s2165_s2 = inlined_call_operand.vmem [shape: f32[1,128], index: 2, kind: input, shape index: {}]   ;;  %s2166_s3 = inlined_call_operand.vmem [shape: bf16[128,128], index: 3, kind: input, shape index: {}]   ;;  %s2167_s4 = inlined_call_operand.vmem [shape: f32[1,128], index: 4, kind: input, shape index: {}]   ;;  %s2168_s5 = inlined_call_operand.vmem [shape: f32[128,1], index: 5, kind: input, shape index: {}]   ;;  %s2169_s6 = inlined_call_operand.<no memory space> [shape: f32[1,1], index: 6, kind: input, shape index: {}]   ;;  %s2170_s7 = inlined_call_operand.vmem [shape: f32[200,1], index: 7, kind: output, shape index: {}]  }
   0x1   :  { %12 = sst [smem:[#allocation2]] %s2169_s6 }
   0x2   :  { %s1785_s26 = smov 0   ;;  %s1787_s27 = smov 0  }
   0x3   :  { %s1789_s28 = smov 0  }
   0x4 LB: > { %s1798_s6 = sadd.s32 4294967295, %s1708_s28   ;;  %s1800_s29 = sadd.s32 1, %s1708_s28   ;;  %s1708_s28 = sphi %s1789_s28, %s2177_s28   ;;  %s1704_s27 = sphi %s1787_s27, %s2176_s27   ;;  %s1700_s26 = sphi %s1785_s26, %s2175_s26  }
   0x5   : > { %s174_s30 = ssub.s32 %s1708_s28, %s1800_s29  ;;  %s177_s8 = sadd.s32 1, %s1704_s27 }
   0x6   : > { %p175_p0 = scmp.eq.s32.totalorder %s174_s30, 0  ;;  %p187_p1 = scmp.ne.s32.totalorder %s1704_s27, %s1700_s26 }
   0x7   : > { %p188_p2 = scmp.eq.s32.totalorder %s1798_s6, 1  ;;  %p1234_p3 = scmp.ge.s32.totalorder %s1708_s28, 1 }
   0x8   : > { %s1808_s9 = scalar_select %p175_p0, %s1704_s27, %s177_s8  }
   0x9   : > { %p1810_p4 = por %p188_p2, %p187_p1  ;;  %p247_p5 = scmp.lt.s32.totalorder %s1708_s28, 3 }
   0xb   : > { %p248_p6 = pnand %p1234_p3, %p247_p5 }
   0xc   : > { %s1818_s13 = sshll.u32 (!%p248_p6), %s1798_s6, 4  ;;  %s695_s22 = sld [smem:[#allocation2]] (!%p248_p6) }
   0xd   : > { %251 = sbr.rel (%p248_p6) target bundleno = 736 (0x2e0), region = 48  ;;  %p287_p7 = scmp.lt.s32.totalorder (!%p248_p6), %s1818_s13, 24 }
   0xe   : > { %s279_s23 = sand.u32 (!%p248_p6), 1, %s1700_s26  }
  0x12   : > { %v1580_v0 = vld [vmem:[%s2164_s1 + $0x8] sm:$0xff]   ;;  %v1581_v1 = vld [vmem:[%s2164_s1] sm:$0xff]   ;;  %v1582_v2 = vld [vmem:[%s2166_s3 + $0x38] sm:$0xff]   ;;  %s288_s18 = scalar_select %p287_p7, %s1818_s13, 24  ;;  %vm349_vm0 = vcmask 261120   ;;  %vm938_vm1 = vcmask 7168  }
  0x13   : > { %1352 = vmatprep.subr.bf16.mxu0 %v1580_v0  ;;  %v1583_v3 = vld [vmem:[%s2166_s3 + $0x30] sm:$0xff]   ;;  %1372 = vmatprep.subr.bf16.mxu1 %v1582_v2  ;;  %v1584_v4 = vld [vmem:[%s2166_s3 + $0x28] sm:$0xff]   ;;  %v1585_v14 = vld [vmem:[%s2166_s3 + $0x20] sm:$0xff]   ;;  %s963_s25 = ssub.s32 (%p1810_p4), 25, %s1818_s13  ;;  %s1291_s28 = sshll.u32 (%p1810_p4), %s1798_s6, 7 }
  0x14   : > { %1353 = vmatpush3.bf16.msra.mxu0 %v1580_v0  ;;  %s1237_s21 = sshll.u32 %s288_s18, 3  ;;  %1373 = vmatpush3.bf16.msra.mxu1 %v1582_v2  ;;  %v1586_v19 = vld [vmem:[%s2166_s3 + $0x18] sm:$0xff]   ;;  %v1587_v31 = vld [vmem:[%s2166_s3 + $0x10] sm:$0xff]   ;;  %v1588_v32 = vld [vmem:[%s2166_s3 + $0x8] sm:$0xff]   ;;  %p964_p8 = scmp.lt.s32.totalorder (%p1810_p4), %s963_s25, 16 }
  0x15   : > { %1354 = vmatprep.subr.bf16.mxu0 %v1581_v1  ;;  %s1834_s24 = scalar_lea.vmem %s2163_s0, %s1237_s21  ;;  %1374 = vmatprep.subr.bf16.mxu1 %v1583_v3  ;;  %v1589_v33 = vld [vmem:[%s2166_s3] sm:$0xff]   ;;  %v694_v34 = vld [vmem:[%s2168_s5 + $0x78] sm:$0xff]  ;;  %v1884_v35 = vld [vmem:[%s2168_s5 + $0x70] sm:$0xff]  ;;  %s2070_s11 = scalar_lea.vmem (%p1810_p4), %s2170_s7, %s1291_s28  }
  0x16   : > { %v302_v5 = vld [vmem:[%s1834_s24] sm:$0xff]  ;;  %v303_v6 = vld [vmem:[%s1834_s24 + $0x8] sm:$0xff]  ;;  %v304_v7 = vld [vmem:[%s1834_s24 + $0x10] sm:$0xff] }
  0x17   : > { %v318_v8 = vpack.c.bf16 %v303_v6, %v302_v5  ;;  %v305_v9 = vld [vmem:[%s1834_s24 + $0x18] sm:$0xff]  ;;  %v306_v10 = vld [vmem:[%s1834_s24 + $0x20] sm:$0xff]  ;;  %v307_v11 = vld [vmem:[%s1834_s24 + $0x28] sm:$0xff] }
  0x18   : > { %1355 = vmatpush3.bf16.msra.mxu0 %v1581_v1  ;;  %v319_v12 = vpack.c.bf16 %v305_v9, %v304_v7  ;;  %v320_v13 = vpack.c.bf16 %v307_v11, %v306_v10  ;;  %1375 = vmatpush3.bf16.msra.mxu1 %v1583_v3  ;;  %v308_v15 = vld [vmem:[%s1834_s24 + $0x30] sm:$0xff]  ;;  %v309_v16 = vld [vmem:[%s1834_s24 + $0x38] sm:$0xff]  ;;  %v310_v17 = vld [vmem:[%s1834_s24 + $0x40] sm:$0xff] }
  0x19   : > { %1356 = vmatprep.mubr.msk.bf16.mxu0 %vm349_vm0, %v318_v8  ;;  %1376 = vmatprep.subr.bf16.mxu1 %v1584_v4  ;;  %v311_v18 = vld [vmem:[%s1834_s24 + $0x48] sm:$0xff]  ;;  %v321_v20 = vpack.c.bf16 %v309_v16, %v308_v15  ;;  %v312_v22 = vld [vmem:[%s1834_s24 + $0x50] sm:$0xff]  ;;  %v313_v23 = vld [vmem:[%s1834_s24 + $0x58] sm:$0xff] }
  0x1a   : > { %v322_v21 = vpack.c.bf16 %v311_v18, %v310_v17  ;;  %v314_v24 = vld [vmem:[%s1834_s24 + $0x60] sm:$0xff]  ;;  %v315_v25 = vld [vmem:[%s1834_s24 + $0x68] sm:$0xff]  ;;  %v323_v26 = vpack.c.bf16 %v313_v23, %v312_v22  ;;  %v316_v28 = vld [vmem:[%s1834_s24 + $0x70] sm:$0xff]  ;;  %1404 = vmatprep.subr.mxu0 %v694_v34 }
  0x1b   : > { %1357 = vmatmul.mubr.msk.bf16.vlgmr.msra.gmra.mxu0 %vm349_vm0, %v319_v12  ;;  %v324_v27 = vpack.c.bf16 %v315_v25, %v314_v24  ;;  %v317_v29 = vld [vmem:[%s1834_s24 + $0x78] sm:$0xff]  ;;  %v1889_v36 = vld [vmem:[%s2168_s5 + $0x68] sm:$0xff]  ;;  %v1896_v37 = vld [vmem:[%s2168_s5 + $0x60] sm:$0xff]  ;;  %s1235_s24 = sshll.u32 %s279_s23, 7 }
  0x1c   : > { %1360 = vmatprep.mubr.msk.bf16.mxu0 %vm349_vm0, %v320_v13  ;;  %1377 = vmatpush3.bf16.msra.mxu1 %v1584_v4  ;;  %v325_v30 = vpack.c.bf16 %v317_v29, %v316_v28  ;;  %v1903_v38 = vld [vmem:[%s2168_s5 + $0x58] sm:$0xff]  ;;  %v1910_v39 = vld [vmem:[%s2168_s5 + $0x50] sm:$0xff]  ;;  %v1917_v40 = vld [vmem:[%s2168_s5 + $0x48] sm:$0xff]  ;;  %s2029_s26 = scalar_lea.vmem [#allocation3], %s1235_s24  }
  0x1d   : > { %1378 = vmatprep.subr.bf16.mxu1 %v1585_v14  ;;  %1405 = vmatpush3.msra.mxu0 %v694_v34  ;;  %v1924_v41 = vld [vmem:[%s2168_s5 + $0x40] sm:$0xff]  ;;  %v1931_v42 = vld [vmem:[%s2168_s5 + $0x38] sm:$0xff]  ;;  %v1938_v43 = vld [vmem:[%s2168_s5 + $0x30] sm:$0xff] }
  0x1e   : > { %1406 = vmatprep.subr.mxu0 %v1884_v35  ;;  %v1945_v44 = vld [vmem:[%s2168_s5 + $0x28] sm:$0xff]  ;;  %v1954_v47 = vld [vmem:[%s2165_s2] ss:$0 sm:$0xff] }
  0x1f   : > { %1407 = vmatpush3.msra.mxu0 %v1884_v35 }
  0x20   : > { %1379 = vmatpush3.bf16.msra.mxu1 %v1585_v14  ;;  %1408 = vmatprep.subr.mxu0 %v1889_v36 }
  0x21   : > { %1380 = vmatprep.subr.bf16.mxu1 %v1586_v19  ;;  %1409 = vmatpush3.msra.mxu0 %v1889_v36 }
  0x22   : > { %1410 = vmatprep.subr.mxu0 %v1896_v37 }
  0x23   : > { %1361 = vmatmul.mubr.msk.bf16.gmra.mxu0 %vm349_vm0, %v321_v20 }
  0x24   : > { %1364 = vmatprep.mubr.msk.bf16.mxu0 %vm349_vm0, %v322_v21  ;;  %1381 = vmatpush3.bf16.msra.mxu1 %v1586_v19 }
  0x25   : > { %1382 = vmatprep.subr.bf16.mxu1 %v1587_v31  ;;  %1411 = vmatpush3.msra.mxu0 %v1896_v37 }
  0x26   : > { %1412 = vmatprep.subr.mxu0 %v1903_v38 }
  0x27   : > { %1413 = vmatpush3.msra.mxu0 %v1903_v38 }
  0x28   : > { %1383 = vmatpush3.bf16.msra.mxu1 %v1587_v31  ;;  %1414 = vmatprep.subr.mxu0 %v1910_v39 }
  0x29   : > { %1384 = vmatprep.subr.bf16.mxu1 %v1588_v32  ;;  %1415 = vmatpush3.msra.mxu0 %v1910_v39 }
  0x2a   : > { %1416 = vmatprep.subr.mxu0 %v1917_v40 }
  0x2b   : > { %1365 = vmatmul.mubr.msk.bf16.gmra.mxu0 %vm349_vm0, %v323_v26 }
  0x2c   : > { %1368 = vmatprep.mubr.msk.bf16.mxu0 %vm349_vm0, %v324_v27  ;;  %1385 = vmatpush3.bf16.msra.mxu1 %v1588_v32 }
  0x2d   : > { %1386 = vmatprep.subr.bf16.mxu1 %v1589_v33  ;;  %1417 = vmatpush3.msra.mxu0 %v1917_v40 }
  0x2e   : > { %1418 = vmatprep.subr.mxu0 %v1924_v41 }
  0x2f   : > { %1419 = vmatpush3.msra.mxu0 %v1924_v41 }
  0x30   : > { %1387 = vmatpush3.bf16.msra.mxu1 %v1589_v33  ;;  %1420 = vmatprep.subr.mxu0 %v1931_v42 }
  0x31   : > { %1460 = vmatprep.subr.mxu1 %v694_v34  ;;  %1421 = vmatpush3.msra.mxu0 %v1931_v42 }
  0x32   : > { %1422 = vmatprep.subr.mxu0 %v1938_v43 }
  0x33   : > { %1369 = vmatmul.mubr.msk.bf16.gmra.mxu0 %vm349_vm0, %v325_v30 }
  0x34   : > { %1423 = vmatpush3.msra.mxu0 %v1938_v43 }
  0x35   : > { %1424 = vmatprep.subr.mxu0 %v1945_v44 }
  0x36   : > { %1425 = vmatpush3.msra.mxu0 %v1945_v44 }
  0xdb   : > { %v1358_v45 = vpop.f32.mrf.mxu0 }
  0xdc   : > { %v417_v51 = vadd.f32 %v1358_v45, %v1954_v47 }
  0xdd   : > { %v408_v46 = vpop.f32.mrf.mxu0 }
  0xde   : > { %v409_v49 = vadd.f32 %v1954_v47, %v408_v46  ;;  %v473_v58 = vmax.f32 %v417_v51, 0.0 }
  0xdf   : > { %v1359_v48 = vpop.f32.mrf.mxu0 }
  0xe0   : > { %v420_v50 = vadd.f32 %v1359_v48, %v1954_v47  ;;  %v471_v56 = vmax.f32 %v409_v49, 0.0 }
  0xe1   : > { %v411_v52 = vpop.f32.mrf.mxu0 }
  0xe2   : > { %v412_v53 = vadd.f32 %v1954_v47, %v411_v52  ;;  %v474_v54 = vmax.f32 %v420_v50, 0.0 }
  0xe3   : > { %v1362_v55 = vpop.f32.mrf.mxu0 }
  0xe4   : > { %v472_v57 = vmax.f32 %v412_v53, 0.0  ;;  %v488_v61 = vpack.c.bf16 %v474_v54, %v473_v58  ;;  %v433_v1 = vadd.f32 %v1362_v55, %v1954_v47 }
  0xe5   : > { %v424_v59 = vpop.f32.mrf.mxu0 }
  0xe6   : > { %v487_v60 = vpack.c.bf16 %v472_v57, %v471_v56  ;;  %v425_v63 = vadd.f32 %v1954_v47, %v424_v59  ;;  %v477_v8 = vmax.f32 %v433_v1, 0.0 }
  0xe7   : > { %v1363_v62 = vpop.f32.mrf.mxu0 }
  0xe8   : > { %v436_v0 = vadd.f32 %v1363_v62, %v1954_v47  ;;  %1388 = vmatprep.mubr.bf16.mxu1 %v487_v60  ;;  %v475_v6 = vmax.f32 %v425_v63, 0.0 }
  0xe9   : > { %v427_v2 = vpop.f32.mrf.mxu0  ;;  %1389 = vmatmul.mubr.bf16.vlgmr.msra.gmra.mxu1 %v488_v61 }
  0xea   : > { %v428_v3 = vadd.f32 %v1954_v47, %v427_v2  ;;  %1476 = vmatpush3.msra.mxu1 %v694_v34  ;;  %v478_v4 = vmax.f32 %v436_v0, 0.0 }
  0xeb   : > { %v1366_v5 = vpop.f32.mrf.mxu0  ;;  %1461 = vmatprep.subr.mxu1 %v1884_v35 }
  0xec   : > { %v476_v7 = vmax.f32 %v428_v3, 0.0  ;;  %1477 = vmatpush3.msra.mxu1 %v1884_v35  ;;  %v490_v11 = vpack.c.bf16 %v478_v4, %v477_v8  ;;  %v449_v15 = vadd.f32 %v1366_v5, %v1954_v47 }
  0xed   : > { %v440_v9 = vpop.f32.mrf.mxu0  ;;  %1462 = vmatprep.subr.mxu1 %v1889_v36 }
  0xee   : > { %v489_v10 = vpack.c.bf16 %v476_v7, %v475_v6  ;;  %1478 = vmatpush3.msra.mxu1 %v1889_v36  ;;  %v441_v13 = vadd.f32 %v1954_v47, %v440_v9  ;;  %v481_v22 = vmax.f32 %v449_v15, 0.0 }
  0xef   : > { %v1367_v12 = vpop.f32.mrf.mxu0  ;;  %1463 = vmatprep.subr.mxu1 %v1896_v37 }
  0xf0   : > { %v452_v14 = vadd.f32 %v1367_v12, %v1954_v47  ;;  %1392 = vmatprep.mubr.bf16.mxu1 %v489_v10  ;;  %1479 = vmatpush3.msra.mxu1 %v1896_v37  ;;  %v479_v20 = vmax.f32 %v441_v13, 0.0 }
  0xf1   : > { %v443_v16 = vpop.f32.mrf.mxu0  ;;  %1393 = vmatmul.mubr.bf16.gmra.mxu1 %v490_v11  ;;  %1464 = vmatprep.subr.mxu1 %v1903_v38 }
  0xf2   : > { %v444_v17 = vadd.f32 %v1954_v47, %v443_v16  ;;  %1480 = vmatpush3.msra.mxu1 %v1903_v38  ;;  %v482_v18 = vmax.f32 %v452_v14, 0.0  ;;  %v683_v38 = vld [vmem:[%s2168_s5 + $0x20] sm:$0xff] }
  0xf3   : > { %v1370_v19 = vpop.f32.mrf.mxu0  ;;  %1465 = vmatprep.subr.mxu1 %v1910_v39  ;;  %1426 = vmatprep.subr.mxu0 %v683_v38 }
  0xf4   : > { %v480_v21 = vmax.f32 %v444_v17, 0.0  ;;  %1481 = vmatpush3.msra.mxu1 %v1910_v39  ;;  %v492_v25 = vpack.c.bf16 %v482_v18, %v481_v22  ;;  %v465_v29 = vadd.f32 %v1370_v19, %v1954_v47  ;;  %1427 = vmatpush3.msra.mxu0 %v683_v38  ;;  %v682_v39 = vld [vmem:[%s2168_s5 + $0x18] sm:$0xff] }
  0xf5   : > { %v456_v23 = vpop.f32.mrf.mxu0  ;;  %1466 = vmatprep.subr.mxu1 %v1917_v40  ;;  %1428 = vmatprep.subr.mxu0 %v682_v39 }
  0xf6   : > { %v491_v24 = vpack.c.bf16 %v480_v21, %v479_v20  ;;  %1482 = vmatpush3.msra.mxu1 %v1917_v40  ;;  %v457_v27 = vadd.f32 %v1954_v47, %v456_v23  ;;  %v485_v35 = vmax.f32 %v465_v29, 0.0  ;;  %1429 = vmatpush3.msra.mxu0 %v682_v39  ;;  %v681_v40 = vld [vmem:[%s2168_s5 + $0x10] sm:$0xff] }
  0xf7   : > { %v1371_v26 = vpop.f32.mrf.mxu0  ;;  %1467 = vmatprep.subr.mxu1 %v1924_v41  ;;  %1430 = vmatprep.subr.mxu0 %v681_v40 }
  0xf8   : > { %v468_v28 = vadd.f32 %v1371_v26, %v1954_v47  ;;  %1396 = vmatprep.mubr.bf16.mxu1 %v491_v24  ;;  %1483 = vmatpush3.msra.mxu1 %v1924_v41  ;;  %v483_v33 = vmax.f32 %v457_v27, 0.0  ;;  %v680_v41 = vld [vmem:[%s2168_s5 + $0x8] sm:$0xff] }
  0xf9   : > { %v459_v30 = vpop.f32.mrf.mxu0  ;;  %1397 = vmatmul.mubr.bf16.gmra.mxu1 %v492_v25  ;;  %1468 = vmatprep.subr.mxu1 %v1931_v42 }
  0xfa   : > { %v460_v31 = vadd.f32 %v1954_v47, %v459_v30  ;;  %1484 = vmatpush3.msra.mxu1 %v1931_v42  ;;  %v486_v32 = vmax.f32 %v468_v28, 0.0  ;;  %1431 = vmatpush3.msra.mxu0 %v681_v40  ;;  %v679_v42 = vld [vmem:[%s2168_s5] sm:$0xff]  ;;  %v2010_v28 = vstv %s695_s22 }
  0xfb   : > { %1469 = vmatprep.subr.mxu1 %v1938_v43  ;;  %1432 = vmatprep.subr.mxu0 %v680_v41 }
  0xfc   : > { %v484_v34 = vmax.f32 %v460_v31, 0.0  ;;  %1485 = vmatpush3.msra.mxu1 %v1938_v43  ;;  %v494_v37 = vpack.c.bf16 %v486_v32, %v485_v35  ;;  %1433 = vmatpush3.msra.mxu0 %v680_v41 }
  0xfd   : > { %1470 = vmatprep.subr.mxu1 %v1945_v44  ;;  %1434 = vmatprep.subr.mxu0 %v679_v42 }
  0xfe   : > { %v493_v36 = vpack.c.bf16 %v484_v34, %v483_v33  ;;  %1486 = vmatpush3.msra.mxu1 %v1945_v44  ;;  %1435 = vmatpush3.msra.mxu0 %v679_v42  ;;  %v1249_v44 = vld [vmem:[%s2167_s4] ss:$0 sm:$0xff] }
  0xff   : > { %1471 = vmatprep.subr.mxu1 %v683_v38 }
 0x100   : > { %1400 = vmatprep.mubr.bf16.mxu1 %v493_v36  ;;  %1487 = vmatpush3.msra.mxu1 %v683_v38 }
 0x101   : > { %1401 = vmatmul.mubr.bf16.gmra.mxu1 %v494_v37  ;;  %1472 = vmatprep.subr.mxu1 %v682_v39 }
 0x102   : > { %1488 = vmatpush3.msra.mxu1 %v682_v39 }
 0x103   : > { %1473 = vmatprep.subr.mxu1 %v681_v40 }
 0x104   : > { %1489 = vmatpush3.msra.mxu1 %v681_v40 }
 0x105   : > { %1474 = vmatprep.subr.mxu1 %v680_v41 }
 0x106   : > { %1490 = vmatpush3.msra.mxu1 %v680_v41 }
 0x107   : > { %1475 = vmatprep.subr.mxu1 %v679_v42 }
 0x108   : > { %1491 = vmatpush3.msra.mxu1 %v679_v42 }
 0x1a9   : > { %v1390_v43 = vpop.f32.mrf.mxu1 }
 0x1aa   : > { %v609_v49 = vadd.f32 %v1390_v43, %v1249_v44 }
 0x1ab   : > { %v600_v45 = vpop.f32.mrf.mxu1 }
 0x1ac   : > { %v601_v46 = vadd.f32 %v1249_v44, %v600_v45  ;;  %v665_v55 = vmax.f32 %v609_v49, 0.0 }
 0x1ad   : > { %v1391_v47 = vpop.f32.mrf.mxu1 }
 0x1ae   : > { %v663_v48 = vmax.f32 %v601_v46, 0.0  ;;  %v612_v53 = vadd.f32 %v1391_v47, %v1249_v44 }
 0x1af   : > { %v603_v50 = vpop.f32.mrf.mxu1 }
 0x1b0   : > { %v604_v51 = vadd.f32 %v1249_v44, %v603_v50  ;;  %1436 = vmatprep.mubr.f32.mxu0 %v663_v48  ;;  %v666_v59 = vmax.f32 %v612_v53, 0.0 }
 0x1b1   : > { %v1394_v52 = vpop.f32.mrf.mxu1 }
 0x1b2   : > { %v664_v54 = vmax.f32 %v604_v51, 0.0  ;;  %v625_v61 = vadd.f32 %v1394_v52, %v1249_v44 }
 0x1b3   : > { %v616_v56 = vpop.f32.mrf.mxu1 }
 0x1b4   : > { %v617_v57 = vadd.f32 %v1249_v44, %v616_v56  ;;  %1437 = vmatmul.mubr.f32.vlgmr.msra.gmra.mxu0 %v664_v54  ;;  %v669_v3 = vmax.f32 %v625_v61, 0.0 }
 0x1b5   : > { %v1395_v58 = vpop.f32.mrf.mxu1  ;;  %1439 = vmatprep.mubr.f32.mxu0 %v665_v55 }
 0x1b6   : > { %v667_v60 = vmax.f32 %v617_v57, 0.0  ;;  %v628_v1 = vadd.f32 %v1395_v58, %v1249_v44 }
 0x1b7   : > { %v619_v62 = vpop.f32.mrf.mxu1 }
 0x1b8   : > { %v620_v63 = vadd.f32 %v1249_v44, %v619_v62  ;;  %1440 = vmatmul.mubr.f32.gmra.mxu0 %v666_v59  ;;  %v670_v7 = vmax.f32 %v628_v1, 0.0 }
 0x1b9   : > { %v1398_v0 = vpop.f32.mrf.mxu1  ;;  %1442 = vmatprep.mubr.f32.mxu0 %v667_v60 }
 0x1ba   : > { %v668_v2 = vmax.f32 %v620_v63, 0.0  ;;  %v641_v9 = vadd.f32 %v1398_v0, %v1249_v44 }
 0x1bb   : > { %v632_v4 = vpop.f32.mrf.mxu1 }
 0x1bc   : > { %v633_v5 = vadd.f32 %v1249_v44, %v632_v4  ;;  %1443 = vmatmul.mubr.f32.gmra.mxu0 %v668_v2  ;;  %v673_v16 = vmax.f32 %v641_v9, 0.0 }
 0x1bd   : > { %v1399_v6 = vpop.f32.mrf.mxu1  ;;  %1445 = vmatprep.mubr.f32.mxu0 %v669_v3 }
 0x1be   : > { %v671_v8 = vmax.f32 %v633_v5, 0.0  ;;  %v644_v13 = vadd.f32 %v1399_v6, %v1249_v44 }
 0x1bf   : > { %v635_v10 = vpop.f32.mrf.mxu1 }
 0x1c0   : > { %v636_v11 = vadd.f32 %v1249_v44, %v635_v10  ;;  %1446 = vmatmul.mubr.f32.gmra.mxu0 %v670_v7  ;;  %v674_v21 = vmax.f32 %v644_v13, 0.0 }
 0x1c1   : > { %v1402_v12 = vpop.f32.mrf.mxu1  ;;  %1448 = vmatprep.mubr.f32.mxu0 %v671_v8 }
 0x1c2   : > { %v672_v14 = vmax.f32 %v636_v11, 0.0  ;;  %v657_v15 = vadd.f32 %v1402_v12, %v1249_v44 }
 0x1c3   : > { %v648_v17 = vpop.f32.mrf.mxu1 }
 0x1c4   : > { %v677_v18 = vmax.f32 %v657_v15, 0.0  ;;  %v649_v19 = vadd.f32 %v1249_v44, %v648_v17  ;;  %1449 = vmatmul.mubr.f32.gmra.mxu0 %v672_v14 }
 0x1c5   : > { %v1403_v20 = vpop.f32.mrf.mxu1  ;;  %1451 = vmatprep.mubr.f32.mxu0 %v673_v16 }
 0x1c6   : > { %v675_v22 = vmax.f32 %v649_v19, 0.0  ;;  %v660_v23 = vadd.f32 %v1403_v20, %v1249_v44  ;;  %1457 = vmatprep.mubr.f32.mxu1 %v677_v18 }
 0x1c7   : > { %v651_v24 = vpop.f32.mrf.mxu1 }
 0x1c8   : > { %v678_v25 = vmax.f32 %v660_v23, 0.0  ;;  %v652_v26 = vadd.f32 %v1249_v44, %v651_v24  ;;  %1452 = vmatmul.mubr.f32.gmra.mxu0 %v674_v21 }
 0x1c9   : > { %1454 = vmatprep.mubr.f32.mxu0 %v675_v22 }
 0x1ca   : > { %v676_v27 = vmax.f32 %v652_v26, 0.0  ;;  %1458 = vmatmul.mubr.f32.vlgmr.msra.gmra.mxu1 %v678_v25 }
 0x1cc   : > { %1455 = vmatmul.mubr.f32.gmra.mxu0 %v676_v27 }
 0x274   : > { %v1438_v29 = vpop.f32.mrf.mxu0 }
 0x275   : > { %v769_v30 = vadd.f32 %v1438_v29, %v2010_v28 }
 0x276   : > { %v763_v31 = vpop.f32.mrf.mxu0 }
 0x277   : > { %v1259_v32 = vmul.f32 -1.442695, %v769_v30  ;;  %v764_v33 = vadd.f32 %v763_v31, %v2010_v28 }
 0x278   : > { %v1441_v34 = vpop.f32.mrf.mxu0 }
 0x279   : > { %1590 = vpow2.f32 %v1259_v32  ;;  %v1258_v35 = vmul.f32 -1.442695, %v764_v33  ;;  %v779_v36 = vadd.f32 %v1441_v34, %v2010_v28 }
 0x27a   : > { %v773_v37 = vpop.f32.mrf.mxu0 }
 0x27b   : > { %1592 = vpow2.f32 %v1258_v35  ;;  %v1261_v38 = vmul.f32 -1.442695, %v779_v36  ;;  %v774_v39 = vadd.f32 %v773_v37, %v2010_v28 }
 0x27c   : > { %v1444_v40 = vpop.f32.mrf.mxu0 }
 0x27d   : > { %1594 = vpow2.f32 %v1261_v38  ;;  %v1260_v41 = vmul.f32 -1.442695, %v774_v39  ;;  %v789_v42 = vadd.f32 %v1444_v40, %v2010_v28 }
 0x27e   : > { %v783_v43 = vpop.f32.mrf.mxu0 }
 0x27f   : > { %1596 = vpow2.f32 %v1260_v41  ;;  %v1263_v44 = vmul.f32 -1.442695, %v789_v42  ;;  %v784_v45 = vadd.f32 %v783_v43, %v2010_v28 }
 0x280   : > { %v1447_v46 = vpop.f32.mrf.mxu0 }
 0x281   : > { %1598 = vpow2.f32 %v1263_v44  ;;  %v1262_v47 = vmul.f32 -1.442695, %v784_v45  ;;  %v799_v48 = vadd.f32 %v1447_v46, %v2010_v28 }
 0x282   : > { %v793_v49 = vpop.f32.mrf.mxu0 }
 0x283   : > { %1600 = vpow2.f32 %v1262_v47  ;;  %v1265_v50 = vmul.f32 -1.442695, %v799_v48  ;;  %v794_v51 = vadd.f32 %v793_v49, %v2010_v28 }
 0x284   : > { %v1450_v52 = vpop.f32.mrf.mxu0 }
 0x285   : > { %1602 = vpow2.f32 %v1265_v50  ;;  %v1264_v53 = vmul.f32 -1.442695, %v794_v51  ;;  %v809_v54 = vadd.f32 %v1450_v52, %v2010_v28 }
 0x286   : > { %v1591_v55 = vpop.eup %1590  ;;  %v803_v56 = vpop.f32.mrf.mxu0 }
 0x287   : > { %v891_v57 = vadd.f32 1.0, %v1591_v55  ;;  %1604 = vpow2.f32 %v1264_v53  ;;  %v1267_v58 = vmul.f32 -1.442695, %v809_v54  ;;  %v804_v59 = vadd.f32 %v803_v56, %v2010_v28 }
 0x288   : > { %v1593_v60 = vpop.eup %1592  ;;  %v1453_v61 = vpop.f32.mrf.mxu0 }
 0x289   : > { %1606 = vrcp.f32 %v891_v57  ;;  %v890_v62 = vadd.f32 1.0, %v1593_v60  ;;  %v1266_v63 = vmul.f32 -1.442695, %v804_v59  ;;  %v819_v0 = vadd.f32 %v1453_v61, %v2010_v28 }
 0x28a   : > { %v1595_v1 = vpop.eup %1594  ;;  %1608 = vpow2.f32 %v1267_v58  ;;  %v813_v2 = vpop.f32.mrf.mxu0 }
 0x28b   : > { %v1459_v3 = vpop.f32.mrf.mxu1  ;;  %1610 = vrcp.f32 %v890_v62  ;;  %v893_v4 = vadd.f32 1.0, %v1595_v1  ;;  %v1269_v5 = vmul.f32 -1.442695, %v819_v0  ;;  %v814_v6 = vadd.f32 %v813_v2, %v2010_v28 }
 0x28c   : > { %v1597_v7 = vpop.eup %1596  ;;  %1612 = vpow2.f32 %v1266_v63  ;;  %v839_v8 = vadd.f32 %v1459_v3, %v2010_v28  ;;  %v1456_v9 = vpop.f32.mrf.mxu0 }
 0x28d   : > { %v833_v10 = vpop.f32.mrf.mxu1  ;;  %1614 = vrcp.f32 %v893_v4  ;;  %v892_v11 = vadd.f32 1.0, %v1597_v7  ;;  %v1268_v12 = vmul.f32 -1.442695, %v814_v6  ;;  %v829_v13 = vadd.f32 %v1456_v9, %v2010_v28 }
 0x28e   : > { %v1599_v14 = vpop.eup %1598  ;;  %1616 = vpow2.f32 %v1269_v5  ;;  %v1273_v15 = vmul.f32 -1.442695, %v839_v8  ;;  %v834_v16 = vadd.f32 %v833_v10, %v2010_v28  ;;  %v823_v17 = vpop.f32.mrf.mxu0 }
 0x28f   : > { %1618 = vrcp.f32 %v892_v11  ;;  %v895_v18 = vadd.f32 1.0, %v1599_v14  ;;  %v1271_v20 = vmul.f32 -1.442695, %v829_v13  ;;  %v824_v21 = vadd.f32 %v823_v17, %v2010_v28 }
 0x290   : > { %v1601_v19 = vpop.eup %1600  ;;  %1620 = vpow2.f32 %v1268_v12  ;;  %v1272_v24 = vmul.f32 -1.442695, %v834_v16 }
 0x291   : > { %1622 = vrcp.f32 %v895_v18  ;;  %v894_v22 = vadd.f32 1.0, %v1601_v19  ;;  %v1270_v27 = vmul.f32 -1.442695, %v824_v21 }
 0x292   : > { %v1603_v23 = vpop.eup %1602  ;;  %1624 = vpow2.f32 %v1273_v15 }
 0x293   : > { %1626 = vrcp.f32 %v894_v22  ;;  %v897_v25 = vadd.f32 1.0, %v1603_v23 }
 0x294   : > { %v1605_v26 = vpop.eup %1604  ;;  %1628 = vpow2.f32 %v1271_v20 }
 0x295   : > { %1630 = vrcp.f32 %v897_v25  ;;  %v896_v29 = vadd.f32 1.0, %v1605_v26 }
 0x296   : > { %v1607_v30 = vpop.eup %1606  ;;  %1632 = vpow2.f32 %v1272_v24 }
 0x297   : > { %v1609_v31 = vpop.eup %1608  ;;  %940 = vst.msk [vmem:[%s2029_s26 + $0x8] sm:$0xff] %vm938_vm1, %v1607_v30  ;;  %1634 = vrcp.f32 %v896_v29 }
 0x298   : > { %v1611_v28 = vpop.eup %1610  ;;  %v899_v32 = vadd.f32 1.0, %v1609_v31  ;;  %1636 = vpow2.f32 %v1270_v27 }
 0x299   : > { %v1613_v33 = vpop.eup %1612  ;;  %939 = vst.msk [vmem:[%s2029_s26] sm:$0xff] %vm938_vm1, %v1611_v28 }
 0x29a   : > { %v1615_v34 = vpop.eup %1614  ;;  %1638 = vrcp.f32 %v899_v32  ;;  %v898_v35 = vadd.f32 1.0, %v1613_v33 }
 0x29b   : > { %v1617_v36 = vpop.eup %1616  ;;  %942 = vst.msk [vmem:[%s2029_s26 + $0x18] sm:$0xff] %vm938_vm1, %v1615_v34 }
 0x29c   : > { %v1619_v37 = vpop.eup %1618  ;;  %1640 = vrcp.f32 %v898_v35  ;;  %v901_v38 = vadd.f32 1.0, %v1617_v36 }
 0x29d   : > { %v1621_v39 = vpop.eup %1620  ;;  %941 = vst.msk [vmem:[%s2029_s26 + $0x10] sm:$0xff] %vm938_vm1, %v1619_v37 }
 0x29e   : > { %v1623_v40 = vpop.eup %1622  ;;  %1642 = vrcp.f32 %v901_v38  ;;  %v900_v41 = vadd.f32 1.0, %v1621_v39 }
 0x29f   : > { %v1625_v42 = vpop.eup %1624  ;;  %944 = vst.msk [vmem:[%s2029_s26 + $0x28] sm:$0xff] %vm938_vm1, %v1623_v40 }
 0x2a0   : > { %v1627_v43 = vpop.eup %1626  ;;  %1644 = vrcp.f32 %v900_v41  ;;  %v905_v44 = vadd.f32 1.0, %v1625_v42 }
 0x2a1   : > { %v1629_v45 = vpop.eup %1628  ;;  %943 = vst.msk [vmem:[%s2029_s26 + $0x20] sm:$0xff] %vm938_vm1, %v1627_v43 }
 0x2a2   : > { %v1631_v46 = vpop.eup %1630  ;;  %1646 = vrcp.f32 %v905_v44  ;;  %v903_v47 = vadd.f32 1.0, %v1629_v45 }
 0x2a3   : > { %v1633_v48 = vpop.eup %1632  ;;  %946 = vst.msk [vmem:[%s2029_s26 + $0x38] sm:$0xff] %vm938_vm1, %v1631_v46 }
 0x2a4   : > { %v1635_v49 = vpop.eup %1634  ;;  %1648 = vrcp.f32 %v903_v47  ;;  %v904_v50 = vadd.f32 1.0, %v1633_v48 }
 0x2a5   : > { %v1637_v51 = vpop.eup %1636  ;;  %945 = vst.msk [vmem:[%s2029_s26 + $0x30] sm:$0xff] %vm938_vm1, %v1635_v49 }
 0x2a6   : > { %1650 = vrcp.f32 %v904_v50  ;;  %v902_v52 = vadd.f32 1.0, %v1637_v51 }
 0x2a7   : > { %v1639_v53 = vpop.eup %1638 }
 0x2a8   : > { %948 = vst.msk [vmem:[%s2029_s26 + $0x48] sm:$0xff] %vm938_vm1, %v1639_v53  ;;  %1652 = vrcp.f32 %v902_v52 }
 0x2a9   : > { %v1641_v54 = vpop.eup %1640 }
 0x2aa   : > { %947 = vst.msk [vmem:[%s2029_s26 + $0x40] sm:$0xff] %vm938_vm1, %v1641_v54 }
 0x2ab   : > { %v1643_v55 = vpop.eup %1642 }
 0x2ac   : > { %950 = vst.msk [vmem:[%s2029_s26 + $0x58] sm:$0xff] %vm938_vm1, %v1643_v55 }
 0x2ad   : > { %v1645_v56 = vpop.eup %1644 }
 0x2ae   : > { %949 = vst.msk [vmem:[%s2029_s26 + $0x50] sm:$0xff] %vm938_vm1, %v1645_v56 }
 0x2af   : > { %v1647_v57 = vpop.eup %1646 }
 0x2b0   : > { %954 = vst.msk [vmem:[%s2029_s26 + $0x78] sm:$0xff] %vm938_vm1, %v1647_v57 }
 0x2b1   : > { %v1649_v58 = vpop.eup %1648 }
 0x2b2   : > { %952 = vst.msk [vmem:[%s2029_s26 + $0x68] sm:$0xff] %vm938_vm1, %v1649_v58  ;;  %961 = sbr.rel (!%p1810_p4) target bundleno = 736 (0x2e0), region = 52 }
 0x2b3   : > { %v1651_v59 = vpop.eup %1650 }
 0x2b4   : > { %953 = vst.msk [vmem:[%s2029_s26 + $0x70] sm:$0xff] %vm938_vm1, %v1651_v59 }
 0x2b5   : > { %v1653_v60 = vpop.eup %1652 }
 0x2b6   : > { %951 = vst.msk [vmem:[%s2029_s26 + $0x60] sm:$0xff] %vm938_vm1, %v1653_v60 }
 0x2b7   : > { %s2179_s25 = smov (!%p964_p8, %s963_s25), 16 }
 0x2b8   : > { %s1276_s12 = sshll.u32 %s2179_s25, 7 }
 0x2b9   : > { %p1279_p9 = scmp.eq.s32.totalorder %s1276_s12, 0 }
 0x2ba   : > { %s2076_s14 = sshrl.u32 (!%p1279_p9), %s2179_s25, 4 }
 0x2bb   : > { %972 = sbr.rel (%p1279_p9) target bundleno = 736 (0x2e0), region = 56  ;;  %p1280_p10 = scmp.le.s32.totalorder (!%p1279_p9), %s2076_s14, 0 }
 0x2c0   : > { %1187 = sbr.rel (%p1280_p10) target bundleno = 719 (0x2cf), region = 132  ;;  %s2172_s6 = smov (!%p1280_p10), %s2070_s11 }
 0x2c1   : > { %s2173_s10 = smov (!%p1280_p10), %s2029_s26  ;;  %s2085_s13 = smov (!%p1280_p10), 0  }
 0x2c2   : > { %s2087_s15 = smov (!%p1280_p10), 0  }
 0x2c5 LB: >> { %v1065_v61 = vld [vmem:[%s1716_s10] sm:$0xff]  ;;  %v1067_v62 = vld [vmem:[%s1716_s10 + $0x8] sm:$0xff]  ;;  %v1069_v63 = vld [vmem:[%s1716_s10 + $0x10] sm:$0xff]  ;;  %s1097_s16 = sadd.s32 1, %s1720_s13  ;;  %s1059_s15 = sadd.s32 1, %s1724_s15   ;;  %s1724_s15 = sphi %s2087_s15, %s1059_s15   ;;  %s1720_s13 = sphi %s2085_s13, %s2174_s13   ;;  %s1716_s10 = sphi %s2173_s10, %s1102_s10   ;;  %s1712_s6 = sphi %s2172_s6, %s1103_s6  }
 0x2c6   : >> { %1066 = vst [vmem:[%s1712_s6] sm:$0xff] %v1065_v61  ;;  %1068 = vst [vmem:[%s1712_s6 + $0x8] sm:$0xff] %v1067_v62  ;;  %v1071_v0 = vld [vmem:[%s1716_s10 + $0x18] sm:$0xff]  ;;  %v1073_v1 = vld [vmem:[%s1716_s10 + $0x20] sm:$0xff]  ;;  %p1098_p11 = scmp.ge.s32.totalorder %s1097_s16, %s2076_s14  ;;  %p1058_p12 = scmp.ge.s32.totalorder %s1059_s15, %s2076_s14 }
 0x2c7   : >> { %1070 = vst [vmem:[%s1712_s6 + $0x10] sm:$0xff] %v1069_v63  ;;  %v1075_v2 = vld [vmem:[%s1716_s10 + $0x28] sm:$0xff]  ;;  %1072 = vst [vmem:[%s1712_s6 + $0x18] sm:$0xff] %v1071_v0  ;;  %v1077_v3 = vld [vmem:[%s1716_s10 + $0x30] sm:$0xff] }
 0x2c8   : >> { %1074 = vst [vmem:[%s1712_s6 + $0x20] sm:$0xff] %v1073_v1  ;;  %1076 = vst [vmem:[%s1712_s6 + $0x28] sm:$0xff] %v1075_v2  ;;  %v1079_v4 = vld [vmem:[%s1716_s10 + $0x38] sm:$0xff]  ;;  %v1081_v5 = vld [vmem:[%s1716_s10 + $0x40] sm:$0xff]  ;;  %s2181_s16 = smov (%p1098_p11, %s1097_s16), 0 }
 0x2c9   : >> { %1078 = vst [vmem:[%s1712_s6 + $0x30] sm:$0xff] %v1077_v3  ;;  %1080 = vst [vmem:[%s1712_s6 + $0x38] sm:$0xff] %v1079_v4  ;;  %v1083_v6 = vld [vmem:[%s1716_s10 + $0x48] sm:$0xff]  ;;  %v1085_v7 = vld [vmem:[%s1716_s10 + $0x50] sm:$0xff]  ;;  %s1281_s17 = sshll.u32 %s2181_s16, 7  ;;  %s2174_s13 = smov %s2181_s16 }
 0x2ca   : >> { %1082 = vst [vmem:[%s1712_s6 + $0x40] sm:$0xff] %v1081_v5  ;;  %v1087_v8 = vld [vmem:[%s1716_s10 + $0x58] sm:$0xff]  ;;  %1084 = vst [vmem:[%s1712_s6 + $0x48] sm:$0xff] %v1083_v6  ;;  %v1089_v9 = vld [vmem:[%s1716_s10 + $0x60] sm:$0xff]  ;;  %1061 = sbr.rel (!%p1058_p12) target bundleno = 709 (0x2c5), region = 138 }
 0x2cb   : >> { %1086 = vst [vmem:[%s1712_s6 + $0x50] sm:$0xff] %v1085_v7  ;;  %1088 = vst [vmem:[%s1712_s6 + $0x58] sm:$0xff] %v1087_v8  ;;  %v1091_v10 = vld [vmem:[%s1716_s10 + $0x68] sm:$0xff]  ;;  %v1093_v11 = vld [vmem:[%s1716_s10 + $0x70] sm:$0xff] }
 0x2cc   : >> { %1090 = vst [vmem:[%s1712_s6 + $0x60] sm:$0xff] %v1089_v9  ;;  %1092 = vst [vmem:[%s1712_s6 + $0x68] sm:$0xff] %v1091_v10  ;;  %v1095_v12 = vld [vmem:[%s1716_s10 + $0x78] sm:$0xff]  ;;  %s1102_s10 = scalar_lea.vmem %s2029_s26, %s1281_s17 [#allocation3]  }
 0x2cd   : >> { %1094 = vst [vmem:[%s1712_s6 + $0x70] sm:$0xff] %v1093_v11  ;;  %1096 = vst [vmem:[%s1712_s6 + $0x78] sm:$0xff] %v1095_v12  ;;  %s1103_s6 = scalar_lea.vmem %s2070_s11, %s1281_s17  }
 0x2cf PF: > { %s2145_s18 = sand.u32 15, %s2179_s25   ;;  %s1292_s19 = sshll.u32 %s2076_s14, 7 }
 0x2d0   : > { %s1108_s20 = scalar_lea.vmem %s2029_s26, %s1292_s19 [#allocation3]   ;;  %s1110_s21 = scalar_lea.vmem %s2070_s11, %s1292_s19  }
 0x2d1   : > { %p1286_p13 = scmp.le.s32.totalorder %s2145_s18, 0 }
 0x2d2   : > { %s1726_s22 = smov (!%p1286_p13), %s1110_s21   ;;  %s1730_s23 = smov (!%p1286_p13), %s1108_s20  }
 0x2d3   : > { %1201 = sbr.rel (%p1286_p13) target bundleno = 736 (0x2e0), region = 143  ;;  %s1734_s24 = smov (!%p1286_p13), 0  }
 0x2d4   : > { %s1738_s28 = smov (!%p1286_p13), 0  }
 0x2d8 LB: >> { %v1120_v13 = vld [vmem:[%s1732_s23] sm:$0xff]  ;;  %s1122_s25 = sadd.s32 1, %s1736_s24  ;;  %s1114_s28 = sadd.s32 1, %s1740_s28   ;;  %s1740_s28 = sphi %s1738_s28, %s1114_s28   ;;  %s1736_s24 = sphi %s1734_s24, %s1735_s24   ;;  %s1732_s23 = sphi %s1730_s23, %s1127_s23   ;;  %s1728_s22 = sphi %s1726_s22, %s1128_s22  }
 0x2d9   : >> { %1121 = vst [vmem:[%s1728_s22] sm:$0xff] %v1120_v13  ;;  %p1123_p0 = scmp.ge.s32.totalorder %s1122_s25, %s2145_s18  ;;  %p1113_p1 = scmp.ge.s32.totalorder %s1114_s28, %s2145_s18 }
 0x2db   : >> { %s2183_s25 = smov (%p1123_p0, %s1122_s25), 0  ;;  %1116 = sbr.rel (!%p1113_p1) target bundleno = 728 (0x2d8), region = 149 }
 0x2dc   : >> { %s1287_s26 = sshll.u32 %s2183_s25, 3  ;;  %s1735_s24 = smov %s2183_s25  }
 0x2dd   : >> { %s1127_s23 = scalar_lea.vmem %s1108_s20, %s1287_s26 [#allocation3]   ;;  %s1128_s22 = scalar_lea.vmem %s1110_s21, %s1287_s26  }
 0x2e0 PF: > { %p15_p2 = scmp.ge.s32.totalorder %s1800_s29, 4   ;;  %s2175_s26 = smov %s1704_s27 }
 0x2e1   : > { %s2176_s27 = smov %s1808_s9  ;;  %s2177_s28 = smov %s1800_s29 }
 0x2e2   :  { %17 = sbr.rel (!%p15_p2) target bundleno = 4 (0x4), region = 160 }

</bundles_post_ra>
